<compile_context>
chip_gen: v5e
topology: v5e:2x2
jax: 0.10.0
libtpu: 0.0.40
codegen_flags: <defaults>
</compile_context>

<pallas_src>
import functools
import math

import jax
import jax.numpy as jnp
from jax.experimental import pallas as pl
from jax.experimental.pallas import tpu as pltpu


def _pick_method(L, pad):
    if pad == 0:
        return "direct"
    scan_rolls = math.ceil(math.log2(max(L, 2))) + 2
    return "direct" if 2 * pad <= max(16, scan_rolls) else "scan"


def _choose_channel_tile(B, L, C, itemsize):
    """Lane-aligned channel tile sized against a ~20 MiB per-block VMEM budget."""
    budget = 20 << 20
    per_col = L * (6 * itemsize + 24)          # blocks (in+2 out, x2 buf) + f32 temps
    max_ct = max(1, budget // per_col)
    if C > 128 and C % 128 == 0:
        ct = min(C, max(128, (max_ct // 128) * 128))
        # Guarantee >=2 blocks on a "parallel" axis when B == 1 (v7x: 2 TCs).
        if B == 1 and ct >= C and C % 256 == 0:
            ct = C // 2
    else:
        ct = C                                  # full-dim block satisfies lane rule
    return ct


def _decomp_kernel(x_ref, res_ref, mean_ref, *, kernel_size, pad, L, method):
    """One (1, L, cT) block: edge-replicated moving average + residual."""
    x = x_ref[0].astype(jnp.float32)                       # (L, cT)

    if pad == 0:
        mean = x
    else:
        t_idx = jax.lax.broadcasted_iota(jnp.int32, (L, 1), 0)   # (L, 1) only
        x0 = x[0:1, :]                                      # (1, cT) first row
        xl = x[L - 1:L, :]                                  # (1, cT) last row

        if method == "direct":
            # Exact O(k) windowed sum: sum_{s=-pad..pad} x[clamp(t+s, 0, L-1)].
            acc = x
            for s in range(1, pad + 1):
                up_shift = (-s) % L
                up = x if up_shift == 0 else pltpu.roll(x, up_shift, axis=0)
                acc = acc + jnp.where(t_idx < L - s, up, xl)     # x[t+s], clamp hi
                dn_shift = s % L
                dn = x if dn_shift == 0 else pltpu.roll(x, dn_shift, axis=0)
                acc = acc + jnp.where(t_idx >= s, dn, x0)        # x[t-s], clamp lo
            win_sum = acc
        else:
            # Inclusive prefix sum over time (roll + mask Hillis-Steele scan).
            cs = x
            shift = 1
            while shift < L:
                prev = pltpu.roll(cs, shift, axis=0)             # cs[t - shift]
                cs = cs + jnp.where(t_idx >= shift, prev, 0.0)
                shift *= 2
            last = cs[L - 1:L, :]                                # (1, cT) total

            # upper[t] = cs[min(L-1, t+pad)]
            if pad >= L:
                upper = jnp.broadcast_to(last, (L, x.shape[1]))
            else:
                up = pltpu.roll(cs, (-pad) % L, axis=0)          # cs[t + pad]
                upper = jnp.where(t_idx < L - pad, up, last)

            # lower[t] = cs[t-pad-1] for t > pad, else 0
            if pad + 1 >= L:
                lower = jnp.zeros_like(x)
            else:
                lo = pltpu.roll(cs, (pad + 1) % L, axis=0)       # cs[t - pad - 1]
                lower = jnp.where(t_idx >= pad + 1, lo, 0.0)

            # Taps that fell off each end and were replaced by x[0] / x[L-1].
            n_front = jnp.maximum(pad - t_idx, 0).astype(jnp.float32)        # (L,1)
            n_end = jnp.maximum(t_idx - (L - 1 - pad), 0).astype(jnp.float32)
            win_sum = (upper - lower) + n_front * x0 + n_end * xl

        mean = win_sum * (1.0 / kernel_size)

    mean_ref[0] = mean.astype(mean_ref.dtype)
    res_ref[0] = (x - mean).astype(res_ref.dtype)


def series_decomp(x, kernel_size, *, method="auto"):
    """x: [B, L, C]. Returns (res, moving_mean), both [B, L, C]."""
    assert kernel_size % 2 == 1 and kernel_size >= 1, "requires odd kernel_size"
    B, L, C = x.shape
    pad = (kernel_size - 1) // 2
    if method == "auto":
        method = _pick_method(L, pad)
    assert method in ("direct", "scan")

    itemsize = jnp.dtype(x.dtype).itemsize
    cT = _choose_channel_tile(B, L, C, itemsize)
    grid = (B, pl.cdiv(C, cT))

    kernel = functools.partial(
        _decomp_kernel, kernel_size=kernel_size, pad=pad, L=L, method=method)

    # Explicit VMEM budget: double-buffered input + 2 outputs + f32 temporaries.
    est_block_bytes = cT * L * (6 * itemsize + 24) + (4 << 20)
    vmem_limit = int(min(max(est_block_bytes, 24 << 20), 48 << 20))

    rolls = (2 * pad) if method == "direct" else (math.ceil(math.log2(max(L, 2))) + 2)
    cost = pl.CostEstimate(
        flops=int(B) * int(L) * int(C) * int(rolls + 4),
        transcendentals=0,
        bytes_accessed=3 * int(B) * int(L) * int(C) * itemsize,
    )

    res, mean = pl.pallas_call(
        kernel,
        out_shape=(
            jax.ShapeDtypeStruct((B, L, C), x.dtype),
            jax.ShapeDtypeStruct((B, L, C), x.dtype),
        ),
        grid_spec=pltpu.PrefetchScalarGridSpec(
            num_scalar_prefetch=0,
            grid=grid,
            in_specs=[pl.BlockSpec((1, L, cT), lambda b, c: (b, 0, c))],
            out_specs=[
                pl.BlockSpec((1, L, cT), lambda b, c: (b, 0, c)),
                pl.BlockSpec((1, L, cT), lambda b, c: (b, 0, c)),
            ],
        ),
        compiler_params=pltpu.CompilerParams(
            dimension_semantics=("parallel", "parallel"),
            vmem_limit_bytes=vmem_limit),
        cost_estimate=cost,
    )(x)
    return res, mean


def _reference_series_decomp(x, kernel_size):
    """Pure-JAX reference mirroring the PyTorch module exactly."""
    pad = (kernel_size - 1) // 2
    B, L, C = x.shape
    front = jnp.broadcast_to(x[:, 0:1, :], (B, pad, C))
    end = jnp.broadcast_to(x[:, -1:, :], (B, pad, C))
    xp = jnp.concatenate([front, x, end], axis=1)
    windows = jnp.stack([xp[:, i:i + L, :] for i in range(kernel_size)], axis=0)
    mean = jnp.mean(windows, axis=0)
    return x - mean, mean


if __name__ == "__main__":
    key = jax.random.PRNGKey(0)
    k1, k2 = jax.random.split(key)

    # Small shape consistent with the module's (batch, time, channels) usage.
    B, L, C = 2, 16, 8
    kernel_size = 5  # odd, as the module assumes
    x = jax.random.normal(k1, (B, L, C), dtype=jnp.float32)

    res_ref_, mean_ref_ = _reference_series_decomp(x, kernel_size)

    # Default ("auto" -> exact O(k) roll-sum path).
    res, mean = series_decomp(x, kernel_size)
    jax.block_until_ready((res, mean))
    assert jnp.allclose(mean, mean_ref_, atol=1e-5, rtol=1e-5), "mean mismatch"
    assert jnp.allclose(res, res_ref_, atol=1e-5, rtol=1e-5), "res mismatch"
    assert res.shape == x.shape and mean.shape == x.shape

    # Large-kernel "scan" (prefix-sum) path, forced, on the same data.
    res_s, mean_s = series_decomp(x, kernel_size, method="scan")
    jax.block_until_ready((res_s, mean_s))
    assert jnp.allclose(mean_s, mean_ref_, atol=1e-5, rtol=1e-5), "scan mean mismatch"
    assert jnp.allclose(res_s, res_ref_, atol=1e-5, rtol=1e-5), "scan res mismatch"

    # Lane-aligned, multi-tile case (B == 1 splits C into two 128-wide tiles).
    B2, L2, C2, k2sz = 1, 32, 256, 7
    x2 = jax.random.normal(k2, (B2, L2, C2), dtype=jnp.float32)
    res2, mean2 = series_decomp(x2, k2sz)
    jax.block_until_ready((res2, mean2))
    r2_ref, m2_ref = _reference_series_decomp(x2, k2sz)
    assert jnp.allclose(mean2, m2_ref, atol=1e-5, rtol=1e-5), "tiled mean mismatch"
    assert jnp.allclose(res2, r2_ref, atol=1e-5, rtol=1e-5), "tiled res mismatch"

    print("KERNEL_OK")
</pallas_src>

<mosaic_0001>
module attributes {stable_mosaic.version = 11 : i64} {
  func.func @_decomp_kernel(%arg0: i32, %arg1: i32, %arg2: memref<1x16x8xf32, #tpu.memory_space<vmem>>, %arg3: memref<1x16x8xf32, #tpu.memory_space<vmem>>, %arg4: memref<1x16x8xf32, #tpu.memory_space<vmem>>) attributes {dimension_semantics = [#tpu.dimension_semantics<parallel>, #tpu.dimension_semantics<parallel>], iteration_bounds = array<i64: 2, 1>, scalar_prefetch = 0 : i64, scratch_operands = 0 : i64, tpu.core_type = #tpu.core_type<tc>, window_params = [{transform_indices = @transform_0, window_bounds = array<i64: 1, 16, 8>}, {transform_indices = @transform_1, window_bounds = array<i64: 1, 16, 8>}, {transform_indices = @transform_2, window_bounds = array<i64: 1, 16, 8>}]} {
    %c0 = arith.constant 0 : index
    %c0_0 = arith.constant 0 : index
    %c0_1 = arith.constant 0 : index
    %0 = vector.load %arg2[%c0, %c0_0, %c0_1] : memref<1x16x8xf32, #tpu.memory_space<vmem>>, vector<1x16x8xf32>
    %1 = vector.shape_cast %0 : vector<1x16x8xf32> to vector<16x8xf32>
    %2 = tpu.iota {dimensions = array<i32: 0>} : vector<16x1xi32>
    %3 = vector.extract_strided_slice %1 {offsets = [0, 0], sizes = [1, 8], strides = [1, 1]} : vector<16x8xf32> to vector<1x8xf32>
    %4 = vector.extract_strided_slice %1 {offsets = [15, 0], sizes = [1, 8], strides = [1, 1]} : vector<16x8xf32> to vector<1x8xf32>
    %c15_i32 = arith.constant 15 : i32
    %5 = tpu.dynamic_rotate %1 by %c15_i32 dim 0 : vector<16x8xf32>, i32 -> vector<16x8xf32>
    %c15_i32_2 = arith.constant 15 : i32
    %6 = vector.broadcast %c15_i32_2 : i32 to vector<16x1xi32>
    %7 = arith.cmpi slt, %2, %6 : vector<16x1xi32>
    %8 = vector.shape_cast %7 : vector<16x1xi1> to vector<16x1xi1>
    %9 = vector.broadcast %8 : vector<16x1xi1> to vector<16x8xi1>
    %10 = vector.shape_cast %4 : vector<1x8xf32> to vector<1x8xf32>
    %11 = vector.broadcast %10 : vector<1x8xf32> to vector<16x8xf32>
    %12 = arith.select %9, %5, %11 : vector<16x8xi1>, vector<16x8xf32>
    %13 = arith.addf %1, %12 : vector<16x8xf32>
    %c1_i32 = arith.constant 1 : i32
    %14 = tpu.dynamic_rotate %1 by %c1_i32 dim 0 : vector<16x8xf32>, i32 -> vector<16x8xf32>
    %c1_i32_3 = arith.constant 1 : i32
    %15 = vector.broadcast %c1_i32_3 : i32 to vector<16x1xi32>
    %16 = arith.cmpi sge, %2, %15 : vector<16x1xi32>
    %17 = vector.shape_cast %16 : vector<16x1xi1> to vector<16x1xi1>
    %18 = vector.broadcast %17 : vector<16x1xi1> to vector<16x8xi1>
    %19 = vector.shape_cast %3 : vector<1x8xf32> to vector<1x8xf32>
    %20 = vector.broadcast %19 : vector<1x8xf32> to vector<16x8xf32>
    %21 = arith.select %18, %14, %20 : vector<16x8xi1>, vector<16x8xf32>
    %22 = arith.addf %13, %21 : vector<16x8xf32>
    %c14_i32 = arith.constant 14 : i32
    %23 = tpu.dynamic_rotate %1 by %c14_i32 dim 0 : vector<16x8xf32>, i32 -> vector<16x8xf32>
    %c14_i32_4 = arith.constant 14 : i32
    %24 = vector.broadcast %c14_i32_4 : i32 to vector<16x1xi32>
    %25 = arith.cmpi slt, %2, %24 : vector<16x1xi32>
    %26 = vector.shape_cast %25 : vector<16x1xi1> to vector<16x1xi1>
    %27 = vector.broadcast %26 : vector<16x1xi1> to vector<16x8xi1>
    %28 = vector.shape_cast %4 : vector<1x8xf32> to vector<1x8xf32>
    %29 = vector.broadcast %28 : vector<1x8xf32> to vector<16x8xf32>
    %30 = arith.select %27, %23, %29 : vector<16x8xi1>, vector<16x8xf32>
    %31 = arith.addf %22, %30 : vector<16x8xf32>
    %c2_i32 = arith.constant 2 : i32
    %32 = tpu.dynamic_rotate %1 by %c2_i32 dim 0 : vector<16x8xf32>, i32 -> vector<16x8xf32>
    %c2_i32_5 = arith.constant 2 : i32
    %33 = vector.broadcast %c2_i32_5 : i32 to vector<16x1xi32>
    %34 = arith.cmpi sge, %2, %33 : vector<16x1xi32>
    %35 = vector.shape_cast %34 : vector<16x1xi1> to vector<16x1xi1>
    %36 = vector.broadcast %35 : vector<16x1xi1> to vector<16x8xi1>
    %37 = vector.shape_cast %3 : vector<1x8xf32> to vector<1x8xf32>
    %38 = vector.broadcast %37 : vector<1x8xf32> to vector<16x8xf32>
    %39 = arith.select %36, %32, %38 : vector<16x8xi1>, vector<16x8xf32>
    %40 = arith.addf %31, %39 : vector<16x8xf32>
    %cst = arith.constant 2.000000e-01 : f32
    %41 = vector.broadcast %cst : f32 to vector<16x8xf32>
    %42 = arith.mulf %40, %41 : vector<16x8xf32>
    %c0_6 = arith.constant 0 : index
    %c0_7 = arith.constant 0 : index
    %c0_8 = arith.constant 0 : index
    %43 = vector.load %arg4[%c0_6, %c0_7, %c0_8] : memref<1x16x8xf32, #tpu.memory_space<vmem>>, vector<1x16x8xf32>
    %44 = vector.shape_cast %43 : vector<1x16x8xf32> to vector<16x8xf32>
    %45 = vector.shape_cast %42 : vector<16x8xf32> to vector<1x16x8xf32>
    tpu.vector_store %arg4[%c0_6, %c0_7, %c0_8], %45 {strides = array<i32>} : memref<1x16x8xf32, #tpu.memory_space<vmem>>, vector<1x16x8xf32>,
    %46 = arith.subf %1, %42 : vector<16x8xf32>
    %c0_9 = arith.constant 0 : index
    %c0_10 = arith.constant 0 : index
    %c0_11 = arith.constant 0 : index
    %47 = vector.load %arg3[%c0_9, %c0_10, %c0_11] : memref<1x16x8xf32, #tpu.memory_space<vmem>>, vector<1x16x8xf32>
    %48 = vector.shape_cast %47 : vector<1x16x8xf32> to vector<16x8xf32>
    %49 = vector.shape_cast %46 : vector<16x8xf32> to vector<1x16x8xf32>
    tpu.vector_store %arg3[%c0_9, %c0_10, %c0_11], %49 {strides = array<i32>} : memref<1x16x8xf32, #tpu.memory_space<vmem>>, vector<1x16x8xf32>,
    return
  }
  func.func @transform_0(%arg0: i32, %arg1: i32) -> (i32, i32, i32) {
    %c0_i32 = arith.constant 0 : i32
    %c0_i32_0 = arith.constant 0 : i32
    return %arg0, %c0_i32, %arg1 : i32, i32, i32
  }
  func.func @transform_1(%arg0: i32, %arg1: i32) -> (i32, i32, i32) {
    %c0_i32 = arith.constant 0 : i32
    %c0_i32_0 = arith.constant 0 : i32
    return %arg0, %c0_i32, %arg1 : i32, i32, i32
  }
  func.func @transform_2(%arg0: i32, %arg1: i32) -> (i32, i32, i32) {
    %c0_i32 = arith.constant 0 : i32
    %c0_i32_0 = arith.constant 0 : i32
    return %arg0, %c0_i32, %arg1 : i32, i32, i32
  }
}

</mosaic_0001>

<bundles_post_ra>
// kernel: tpu_custom_call.1
= control target key start
LH: loop header
LB: loop body
LE: loop exit
PB: predicated region body
PF: predicated region fallthrough
CT: control target
= control target key end

     0   :  { %s481_s9 = smov 0   ;;  %s483_s10 = smov 0   ;;  %s531_s0 = inlined_call_operand.vmem [shape: f32[2,16,8], index: 0, kind: input, shape index: {}]   ;;  %s532_s1 = inlined_call_operand.vmem [shape: f32[2,16,8], index: 1, kind: output, shape index: {0}]   ;;  %s533_s2 = inlined_call_operand.vmem [shape: f32[2,16,8], index: 2, kind: output, shape index: {1}]  }
   0x1   :  { %s485_s11 = smov 0  }
   0x2 LB: > { %s25_s12 = sadd.s32 1, %s460_s10  ;;  %p406_p0 = scmp.ge.s32.totalorder %s464_s11, 1  ;;  %s464_s11 = sphi %s485_s11, %s13_s11   ;;  %s460_s10 = sphi %s483_s10, %s535_s10   ;;  %s456_s9 = sphi %s481_s9, %s534_s9  }
   0x3   : > { %p27_p1 = scmp.ge.s32.totalorder %s25_s12, 2  ;;  %p136_p2 = scmp.lt.s32.totalorder %s464_s11, 3 }
   0x5   : > { %s537_s12 = smov (%p27_p1, %s25_s12), 0  ;;  %p137_p3 = pnand %p406_p0, %p136_p2 }
   0x6   : > { %p172_p4 = scmp.lt.s32.totalorder (!%p137_p3), %s456_s9, 1 }
   0x7   : > { %140 = sbr.rel (%p137_p3) target bundleno = 38 (0x26), region = 24 }
   0xc   : > { %v198_v0 = vlaneseq  ;;  %s539_s9 = smov (!%p172_p4, %s456_s9), 1  ;;  %vm265_vm8 = vcmask 64512  }
   0xd   : > { %s499_s13 = sshll.u32 %s539_s9, 4 }
   0xe   : > { %v199_v1 = vshrl.u32 %v198_v0, 7  ;;  %s179_s16 = scalar_lea.vmem %s531_s0, %s499_s13  ;;  %s195_s19 = scalar_lea.vmem %s533_s2, %s499_s13 }
   0xf   : > { %v196_v2 = vld [vmem:[%s179_s16] sm:$0xff]  ;;  %v197_v3 = vld [vmem:[%s179_s16 + $0x8] sm:$0xff]  ;;  %s187_s22 = scalar_lea.vmem %s532_s1, %s499_s13 }
  0x10   : > { %vm203_vm0 = vcmp.lt.s32.totalorder %v199_v1, 7  ;;  %vm219_vm1 = vcmp.lt.s32.totalorder %v199_v1, 1  ;;  %vm222_vm2 = vcmp.ge.s32.totalorder %v199_v1, 1  ;;  %vm235_vm3 = vcmp.lt.s32.totalorder %v199_v1, 6 }
  0x11   : > { %vm250_vm4 = vcmp.lt.s32.totalorder %v199_v1, 2  ;;  %v200_v4 = vadd.s32 8, %v199_v1  ;;  %v201_v5 = vrot.slane %v196_v2, 1  ;;  %v202_v6 = vrot.slane %v197_v3, 1 }
  0x12   : > { %v217_v7 = vrot.slane %v196_v2, 7  ;;  %v218_v8 = vrot.slane %v197_v3, 7  ;;  %v228_v9 = vperm.slane %v196_v2, 0  ;;  %v233_v10 = vrot.slane %v196_v2, 2 }
  0x13   : > { %v234_v11 = vrot.slane %v197_v3, 2  ;;  %v248_v12 = vrot.slane %v196_v2, 6  ;;  %v204_v13 = vsel %vm203_vm0, %v201_v5, %v202_v6  ;;  %v249_v15 = vrot.slane %v197_v3, 6 }
  0x14   : > { %v221_v14 = vsel %vm219_vm1, %v218_v8, %v217_v7  ;;  %vm253_vm5 = vcmp.ge.s32.totalorder %v199_v1, 2  ;;  %v215_v16 = vadd.f32 %v204_v13, %v196_v2  ;;  %v205_v18 = vsel %vm203_vm0, %v202_v6, %v201_v5 }
  0x15   : > { %v229_v17 = vsel %vm222_vm2, %v221_v14, %v228_v9  ;;  %vm207_vm6 = vcmp.lt.s32.totalorder %v200_v4, 15  ;;  %v236_v19 = vsel %vm235_vm3, %v233_v10, %v234_v11  ;;  %v252_v20 = vsel %vm250_vm4, %v249_v15, %v248_v12 }
  0x16   : > { %v212_v21 = vperm.slane %v197_v3, 7  ;;  %v231_v22 = vadd.f32 %v229_v17, %v215_v16  ;;  %v237_v23 = vsel %vm235_vm3, %v234_v11, %v233_v10  ;;  %vm239_vm7 = vcmp.lt.s32.totalorder %v200_v4, 14 }
  0x17   : > { %v259_v24 = vsel %vm253_vm5, %v252_v20, %v228_v9  ;;  %v220_v26 = vsel %vm219_vm1, %v217_v7, %v218_v8  ;;  %v251_v32 = vsel %vm250_vm4, %v248_v12, %v249_v15 }
  0x18   : > { %v214_v25 = vsel %vm207_vm6, %v205_v18, %v212_v21  ;;  %v246_v27 = vadd.f32 %v236_v19, %v231_v22  ;;  %v245_v29 = vsel %vm239_vm7, %v237_v23, %v212_v21 }
  0x19   : > { %v216_v28 = vadd.f32 %v214_v25, %v197_v3 }
  0x1a   : > { %v261_v30 = vadd.f32 %v259_v24, %v246_v27 }
  0x1b   : > { %v232_v31 = vadd.f32 %v220_v26, %v216_v28 }
  0x1c   : > { %v263_v33 = vmul.f32 0.2, %v261_v30 }
  0x1d   : > { %v247_v34 = vadd.f32 %v245_v29, %v232_v31 }
  0x1e   : > { %266 = vst.msk [vmem:[%s195_s19] sm:$0xff] %vm265_vm8, %v263_v33  ;;  %v268_v36 = vsub.f32 %v196_v2, %v263_v33 }
  0x1f   : > { %v262_v35 = vadd.f32 %v251_v32, %v247_v34 }
  0x20   : > { %270 = vst.msk [vmem:[%s187_s22] sm:$0xff] %vm265_vm8, %v268_v36 }
  0x21   : > { %v264_v37 = vmul.f32 0.2, %v262_v35 }
  0x23   : > { %267 = vst.msk [vmem:[%s195_s19 + $0x8] sm:$0xff] %vm265_vm8, %v264_v37  ;;  %v269_v38 = vsub.f32 %v197_v3, %v264_v37 }
  0x25   : > { %271 = vst.msk [vmem:[%s187_s22 + $0x8] sm:$0xff] %vm265_vm8, %v269_v38 }
  0x26 PF: > { %s13_s11 = sadd.s32 1, %s464_s11   ;;  %s534_s9 = smov %s460_s10 }
  0x27   : > { %p10_p5 = scmp.ge.s32.totalorder %s13_s11, 4   ;;  %s535_s10 = smov %s537_s12 }
  0x29   :  { %12 = sbr.rel (!%p10_p5) target bundleno = 2 (0x2), region = 66 }

</bundles_post_ra>
